<compile_context>
chip_gen: v7x
topology: tpu7x:2x2x1
jax: 0.10.0
libtpu: 0.0.40
codegen_flags: <defaults>
</compile_context>

<pallas_src>
import functools

import jax
import jax.numpy as jnp
from jax.experimental import pallas as pl
from jax.experimental.pallas import tpu as pltpu


def _round_up(x, m):
    return (x + m - 1) // m * m


def _graphconv_kernel(feat_self_ref, a_ref, feat_nbr_ref, w_ref, b_ref,
                      o_ref, acc_ref, self_ref, *, dp, tk, resident):
    """One (batch, row-tile, neighbour-tile) grid step."""
    k = pl.program_id(2)

    @pl.when(k == 0)
    def _init():
        acc_ref[...] = jnp.zeros_like(acc_ref)
        # Self-term projection hoisted off the finalize path: the k loop is
        # HBM-bound on A, so the MXU has slack here to hide this matmul.
        self_ref[...] = (
            jnp.dot(feat_self_ref[0], w_ref[:dp, :],
                    preferred_element_type=jnp.float32)
            + b_ref[...])

    if resident:
        # Neighbour features are VMEM-resident for the whole batch; slice the
        # current TK rows in-kernel (no HBM re-read per row tile).
        nbr = feat_nbr_ref[0, pl.ds(pl.multiple_of(k * tk, tk), tk), :]
    else:
        nbr = feat_nbr_ref[0]

    # Mean aggregation: acc += A_tile @ feat_nbr_tile (bf16 in, f32 accumulate).
    acc_ref[...] += jnp.dot(a_ref[0], nbr, preferred_element_type=jnp.float32)

    @pl.when(k == pl.num_programs(2) - 1)
    def _finalize():
        out = self_ref[...] + jnp.dot(
            acc_ref[...].astype(w_ref.dtype), w_ref[dp:, :],
            preferred_element_type=jnp.float32)
        o_ref[0] = jnp.maximum(out, 0.0).astype(o_ref.dtype)


def _pick_tiles(n, dp, batch):
    """Choose (Np, TM, TK, resident) for the node axis.

    TK is the largest of {2048,1024,512,256,128} whose padding overhead over
    the minimal 128-padding is <= 12.5% extra rows (avoids the N=513 -> Np=1024
    blow-up). TM <= min(TK, 512) and is shrunk if needed so small-batch cases
    still expose >= 2 parallel row tiles (v7x megacore).
    """
    n_min = _round_up(n, 128)
    tk = 128
    for cand in (2048, 1024, 512, 256):
        if _round_up(n, cand) - n_min <= n_min // 8:
            tk = cand
            break
    np_ = _round_up(n, tk)
    tm = min(tk, 512)
    while batch * (np_ // tm) < 2 and tm > 128:
        tm //= 2
    # Resident neighbour-feature slab if it fits a conservative budget
    # (leaves room for A double-buffers / weight / output on v7x's 64 MiB VMEM).
    resident = np_ * dp * 2 <= 16 * 1024 * 1024
    return np_, tm, tk, resident


@functools.partial(jax.jit, static_argnames=("compute_dtype",))
def graph_conv(features, A, weight, bias, *, compute_dtype=jnp.bfloat16):
    """features: (B, N, D) or (N, D); A: (B, N, N) or (N, N), row-normalized;
    weight: (2D, F); bias: (F,).  Returns relu(concat([feat, A@feat]) @ W + b).

    Tip: pass A already cast to `compute_dtype` (and reuse it across layers) to
    avoid an extra full HBM pass over A in the wrapper.
    """
    squeeze = features.ndim == 2
    if squeeze:
        features, A = features[None], A[None]

    B, N, D = features.shape
    F = weight.shape[1]
    out_dtype = features.dtype

    Dp = _round_up(D, 128)
    Fp = _round_up(F, 128)
    Np, TM, TK, resident = _pick_tiles(N, Dp, B)
    # TODO(synk): tile Fp (extra grid axis on the weight/output) and Dp for very
    # wide models (D=F>=4096) where the (2*Dp, Fp) weight block alone would not
    # fit v7x's 64 MiB VMEM; typical GCN dims fit as-is.

    if N == Np and D == Dp and features.dtype == compute_dtype:
        feat_p = features
    else:
        feat_p = jnp.pad(features,
                         ((0, 0), (0, Np - N), (0, Dp - D))).astype(compute_dtype)
    if N == Np and A.dtype == compute_dtype:
        a_p = A  # pre-cast / pre-padded A: no extra HBM pass in the wrapper
    else:
        a_p = jnp.pad(A, ((0, 0), (0, Np - N), (0, Np - N))).astype(compute_dtype)

    # Split weight halves land at lane-aligned offsets 0 and Dp, matching the
    # in-kernel [self | agg] projection split.
    w_p = jnp.zeros((2 * Dp, Fp), dtype=compute_dtype)
    w_p = w_p.at[:D, :F].set(weight[:D].astype(compute_dtype))
    w_p = w_p.at[Dp:Dp + D, :F].set(weight[D:].astype(compute_dtype))
    b_p = jnp.zeros((1, Fp), dtype=jnp.float32).at[0, :F].set(
        bias.astype(jnp.float32))

    itemsize = jnp.dtype(compute_dtype).itemsize
    if resident:
        feat_bytes = 2 * B * Np * Dp * itemsize           # self rows + resident slab
        nbr_spec = pl.BlockSpec((1, Np, Dp), lambda b, i, k: (b, 0, 0))
    else:
        feat_bytes = (B * Np * Dp + B * (Np // TM) * Np * Dp) * itemsize
        nbr_spec = pl.BlockSpec((1, TK, Dp), lambda b, i, k: (b, k, 0))

    cost = pl.CostEstimate(
        flops=2 * B * Np * Np * Dp + 2 * B * Np * (2 * Dp) * Fp,
        transcendentals=0,
        bytes_accessed=(B * Np * Np + 2 * Dp * Fp) * itemsize + feat_bytes
        + B * Np * Fp * jnp.dtype(out_dtype).itemsize + Fp * 4,
    )

    kernel = functools.partial(_graphconv_kernel, dp=Dp, tk=TK, resident=resident)

    out = pl.pallas_call(
        kernel,
        out_shape=jax.ShapeDtypeStruct((B, Np, Fp), out_dtype),
        grid_spec=pltpu.PrefetchScalarGridSpec(
            num_scalar_prefetch=0,
            grid=(B, Np // TM, Np // TK),
            in_specs=[
                pl.BlockSpec((1, TM, Dp), lambda b, i, k: (b, i, 0)),   # self rows
                pl.BlockSpec((1, TM, TK), lambda b, i, k: (b, i, k)),   # A tile
                nbr_spec,                                               # neighbour rows
                pl.BlockSpec((2 * Dp, Fp), lambda b, i, k: (0, 0)),     # weight
                pl.BlockSpec((1, Fp), lambda b, i, k: (0, 0)),          # bias
            ],
            out_specs=pl.BlockSpec((1, TM, Fp), lambda b, i, k: (b, i, 0)),
            scratch_shapes=[
                pltpu.VMEM((TM, Dp), jnp.float32),   # aggregation accumulator
                pltpu.VMEM((TM, Fp), jnp.float32),   # hoisted self-term projection
            ],
        ),
        compiler_params=pltpu.CompilerParams(
            dimension_semantics=("parallel", "parallel", "arbitrary"),
            # Large tiles need more than the scoped default (16-32 MiB); 56 MiB
            # stays inside v7x's 64 MiB physical VMEM and v5e/v6e's 128 MiB.
            vmem_limit_bytes=56 * 1024 * 1024,
        ),
        cost_estimate=cost,
    )(feat_p, a_p, feat_p, w_p, b_p)

    out = out[:, :N, :F]
    return out[0] if squeeze else out


def _reference(features, A, weight, bias):
    agg = jnp.einsum("...ij,...jd->...id", A, features)
    cat = jnp.concatenate([features, agg], axis=-1)
    out = jnp.einsum("...nd,df->...nf", cat, weight) + bias
    return jax.nn.relu(out)


if __name__ == "__main__":
    key = jax.random.PRNGKey(0)
    B, N, in_dim, out_dim = 2, 16, 8, 16

    k_feat, k_adj, k_w = jax.random.split(key, 3)

    features = jax.random.normal(k_feat, (B, N, in_dim), dtype=jnp.float32)

    # Random adjacency with self-loops, row-normalized (mean aggregation).
    adj = (jax.random.uniform(k_adj, (B, N, N)) > 0.5).astype(jnp.float32)
    adj = jnp.minimum(adj + jnp.eye(N, dtype=jnp.float32)[None], 1.0)
    A = adj / jnp.sum(adj, axis=-1, keepdims=True)

    # Parameters: xavier_uniform_ for weight (shape (2*in_dim, out_dim)), zero bias.
    fan_in, fan_out = 2 * in_dim, out_dim
    bound = (6.0 / (fan_in + fan_out)) ** 0.5
    weight = jax.random.uniform(
        k_w, (2 * in_dim, out_dim), minval=-bound, maxval=bound, dtype=jnp.float32
    )
    bias = jnp.zeros((out_dim,), dtype=jnp.float32)

    out = graph_conv(features, A, weight, bias)
    out = jax.block_until_ready(out)

    ref = _reference(features, A, weight, bias)
    assert out.shape == ref.shape
    # bf16 streaming of A/features/W -> bf16-level tolerance vs. the f32 reference.
    assert jnp.allclose(out, ref, atol=5e-2, rtol=5e-2), float(
        jnp.max(jnp.abs(out - ref)))

    print("KERNEL_OK")
</pallas_src>

<mosaic_0001>
module attributes {stable_mosaic.version = 11 : i64} {
  func.func @_graphconv_kernel(%arg0: i32, %arg1: i32, %arg2: i32, %arg3: memref<1x128x128xbf16, #tpu.memory_space<vmem>>, %arg4: memref<1x128x128xbf16, #tpu.memory_space<vmem>>, %arg5: memref<1x128x128xbf16, #tpu.memory_space<vmem>>, %arg6: memref<256x128xbf16, #tpu.memory_space<vmem>>, %arg7: memref<1x128xf32, #tpu.memory_space<vmem>>, %arg8: memref<1x128x128xf32, #tpu.memory_space<vmem>>, %arg9: memref<128x128xf32, #tpu.memory_space<vmem>>, %arg10: memref<128x128xf32, #tpu.memory_space<vmem>>) attributes {dimension_semantics = [#tpu.dimension_semantics<parallel>, #tpu.dimension_semantics<parallel>, #tpu.dimension_semantics<arbitrary>], iteration_bounds = array<i64: 2, 1, 1>, scalar_prefetch = 0 : i64, scratch_operands = 2 : i64, tpu.core_type = #tpu.core_type<tc>, window_params = [{transform_indices = @transform_0, window_bounds = array<i64: 1, 128, 128>}, {transform_indices = @transform_1, window_bounds = array<i64: 1, 128, 128>}, {transform_indices = @transform_2, window_bounds = array<i64: 1, 128, 128>}, {pipeline_mode = #tpu.pipeline_mode<synchronous>, transform_indices = @transform_3, window_bounds = array<i64: 256, 128>}, {pipeline_mode = #tpu.pipeline_mode<synchronous>, transform_indices = @transform_4, window_bounds = array<i64: 1, 128>}, {transform_indices = @transform_5, window_bounds = array<i64: 1, 128, 128>}]} {
    %c0_i32 = arith.constant 0 : i32
    %0 = arith.cmpi eq, %arg2, %c0_i32 : i32
    %1 = arith.extui %0 : i1 to i32
    %c0_i32_0 = arith.constant 0 : i32
    %2 = arith.cmpi ne, %1, %c0_i32_0 : i32
    scf.if %2 {
      %cst_11 = arith.constant 0.000000e+00 : f32
      %17 = vector.broadcast %cst_11 : f32 to vector<128x128xf32>
      %c0_12 = arith.constant 0 : index
      %c0_13 = arith.constant 0 : index
      %18 = vector.load %arg9[%c0_12, %c0_13] : memref<128x128xf32, #tpu.memory_space<vmem>>, vector<128x128xf32>
      tpu.vector_store %arg9[%c0_12, %c0_13], %17 {strides = array<i32>} : memref<128x128xf32, #tpu.memory_space<vmem>>, vector<128x128xf32>,
      %c0_14 = arith.constant 0 : index
      %c0_15 = arith.constant 0 : index
      %c0_16 = arith.constant 0 : index
      %19 = vector.load %arg3[%c0_14, %c0_15, %c0_16] : memref<1x128x128xbf16, #tpu.memory_space<vmem>>, vector<1x128x128xbf16>
      %20 = vector.shape_cast %19 : vector<1x128x128xbf16> to vector<128x128xbf16>
      %c0_17 = arith.constant 0 : index
      %c0_18 = arith.constant 0 : index
      %21 = vector.load %arg6[%c0_17, %c0_18] : memref<256x128xbf16, #tpu.memory_space<vmem>>, vector<128x128xbf16>
      %cst_19 = arith.constant dense<0.000000e+00> : vector<128x128xf32>
      %22 = tpu.matmul %20, %21, %cst_19 {dimension_numbers = #tpu.dot_dimension_numbers<[1], [0], [0], [1], [0, 0, 1, 1], [], []>} : vector<128x128xbf16>, vector<128x128xbf16>, vector<128x128xf32> -> vector<128x128xf32>
      %c0_20 = arith.constant 0 : index
      %c0_21 = arith.constant 0 : index
      %23 = vector.load %arg7[%c0_20, %c0_21] : memref<1x128xf32, #tpu.memory_space<vmem>>, vector<1x128xf32>
      %24 = vector.broadcast %23 : vector<1x128xf32> to vector<128x128xf32>
      %25 = arith.addf %22, %24 : vector<128x128xf32>
      %c0_22 = arith.constant 0 : index
      %c0_23 = arith.constant 0 : index
      %26 = vector.load %arg10[%c0_22, %c0_23] : memref<128x128xf32, #tpu.memory_space<vmem>>, vector<128x128xf32>
      tpu.vector_store %arg10[%c0_22, %c0_23], %25 {strides = array<i32>} : memref<128x128xf32, #tpu.memory_space<vmem>>, vector<128x128xf32>,
    } else {
    }
    %c128_i32 = arith.constant 128 : i32
    %3 = arith.muli %arg2, %c128_i32 : i32
    %4 = tpu.assume_multiple %3, 128 : i32
    %c0 = arith.constant 0 : index
    %5 = arith.index_cast %4 : i32 to index
    %c0_1 = arith.constant 0 : index
    %6 = vector.load %arg5[%c0, %5, %c0_1] : memref<1x128x128xbf16, #tpu.memory_space<vmem>>, vector<1x128x128xbf16>
    %7 = vector.shape_cast %6 : vector<1x128x128xbf16> to vector<128x128xbf16>
    %c0_2 = arith.constant 0 : index
    %c0_3 = arith.constant 0 : index
    %8 = vector.load %arg9[%c0_2, %c0_3] : memref<128x128xf32, #tpu.memory_space<vmem>>, vector<128x128xf32>
    %c0_4 = arith.constant 0 : index
    %c0_5 = arith.constant 0 : index
    %c0_6 = arith.constant 0 : index
    %9 = vector.load %arg4[%c0_4, %c0_5, %c0_6] : memref<1x128x128xbf16, #tpu.memory_space<vmem>>, vector<1x128x128xbf16>
    %10 = vector.shape_cast %9 : vector<1x128x128xbf16> to vector<128x128xbf16>
    %cst = arith.constant dense<0.000000e+00> : vector<128x128xf32>
    %11 = tpu.matmul %10, %7, %cst {dimension_numbers = #tpu.dot_dimension_numbers<[1], [0], [0], [1], [0, 0, 1, 1], [], []>} : vector<128x128xbf16>, vector<128x128xbf16>, vector<128x128xf32> -> vector<128x128xf32>
    %12 = arith.addf %8, %11 : vector<128x128xf32>
    %c0_7 = arith.constant 0 : index
    %c0_8 = arith.constant 0 : index
    %13 = vector.load %arg9[%c0_7, %c0_8] : memref<128x128xf32, #tpu.memory_space<vmem>>, vector<128x128xf32>
    tpu.vector_store %arg9[%c0_7, %c0_8], %12 {strides = array<i32>} : memref<128x128xf32, #tpu.memory_space<vmem>>, vector<128x128xf32>,
    %c0_i32_9 = arith.constant 0 : i32
    %14 = arith.cmpi eq, %arg2, %c0_i32_9 : i32
    %15 = arith.extui %14 : i1 to i32
    %c0_i32_10 = arith.constant 0 : i32
    %16 = arith.cmpi ne, %15, %c0_i32_10 : i32
    scf.if %16 {
      %c0_11 = arith.constant 0 : index
      %c0_12 = arith.constant 0 : index
      %17 = vector.load %arg10[%c0_11, %c0_12] : memref<128x128xf32, #tpu.memory_space<vmem>>, vector<128x128xf32>
      %c0_13 = arith.constant 0 : index
      %c0_14 = arith.constant 0 : index
      %18 = vector.load %arg9[%c0_13, %c0_14] : memref<128x128xf32, #tpu.memory_space<vmem>>, vector<128x128xf32>
      %19 = arith.truncf %18 : vector<128x128xf32> to vector<128x128xbf16>
      %c128 = arith.constant 128 : index
      %c0_15 = arith.constant 0 : index
      %20 = vector.load %arg6[%c128, %c0_15] : memref<256x128xbf16, #tpu.memory_space<vmem>>, vector<128x128xbf16>
      %cst_16 = arith.constant dense<0.000000e+00> : vector<128x128xf32>
      %21 = tpu.matmul %19, %20, %cst_16 {dimension_numbers = #tpu.dot_dimension_numbers<[1], [0], [0], [1], [0, 0, 1, 1], [], []>} : vector<128x128xbf16>, vector<128x128xbf16>, vector<128x128xf32> -> vector<128x128xf32>
      %22 = arith.addf %17, %21 : vector<128x128xf32>
      %cst_17 = arith.constant 0.000000e+00 : f32
      %23 = vector.broadcast %cst_17 : f32 to vector<128x128xf32>
      %24 = arith.maximumf %22, %23 : vector<128x128xf32>
      %c0_18 = arith.constant 0 : index
      %c0_19 = arith.constant 0 : index
      %c0_20 = arith.constant 0 : index
      %25 = vector.load %arg8[%c0_18, %c0_19, %c0_20] : memref<1x128x128xf32, #tpu.memory_space<vmem>>, vector<1x128x128xf32>
      %26 = vector.shape_cast %25 : vector<1x128x128xf32> to vector<128x128xf32>
      %27 = vector.shape_cast %24 : vector<128x128xf32> to vector<1x128x128xf32>
      tpu.vector_store %arg8[%c0_18, %c0_19, %c0_20], %27 {strides = array<i32>} : memref<1x128x128xf32, #tpu.memory_space<vmem>>, vector<1x128x128xf32>,
    } else {
    }
    return
  }
  func.func @transform_0(%arg0: i32, %arg1: i32, %arg2: i32) -> (i32, i32, i32) {
    %c0_i32 = arith.constant 0 : i32
    %c0_i32_0 = arith.constant 0 : i32
    return %arg0, %arg1, %c0_i32 : i32, i32, i32
  }
  func.func @transform_1(%arg0: i32, %arg1: i32, %arg2: i32) -> (i32, i32, i32) {
    %c0_i32 = arith.constant 0 : i32
    return %arg0, %arg1, %arg2 : i32, i32, i32
  }
  func.func @transform_2(%arg0: i32, %arg1: i32, %arg2: i32) -> (i32, i32, i32) {
    %c0_i32 = arith.constant 0 : i32
    %c0_i32_0 = arith.constant 0 : i32
    %c0_i32_1 = arith.constant 0 : i32
    return %arg0, %c0_i32, %c0_i32_0 : i32, i32, i32
  }
  func.func @transform_3(%arg0: i32, %arg1: i32, %arg2: i32) -> (i32, i32) {
    %c0_i32 = arith.constant 0 : i32
    %c0_i32_0 = arith.constant 0 : i32
    %c0_i32_1 = arith.constant 0 : i32
    return %c0_i32, %c0_i32_0 : i32, i32
  }
  func.func @transform_4(%arg0: i32, %arg1: i32, %arg2: i32) -> (i32, i32) {
    %c0_i32 = arith.constant 0 : i32
    %c0_i32_0 = arith.constant 0 : i32
    %c0_i32_1 = arith.constant 0 : i32
    return %c0_i32, %c0_i32_0 : i32, i32
  }
  func.func @transform_5(%arg0: i32, %arg1: i32, %arg2: i32) -> (i32, i32, i32) {
    %c0_i32 = arith.constant 0 : i32
    %c0_i32_0 = arith.constant 0 : i32
    return %arg0, %arg1, %c0_i32 : i32, i32, i32
  }
}

</mosaic_0001>

<bundles_post_ra>
// kernel: graph_conv.1
= control target key start
LH: loop header
LB: loop body
LE: loop exit
PB: predicated region body
PF: predicated region fallthrough
CT: control target
= control target key end

     0   :  { %s1632_s18 = smov 0   ;;  %s1634_s19 = smov 0   ;;  %s1794_s0 = inlined_call_operand.vmem [shape: bf16[2,128,128], index: 0, kind: input, shape index: {}, may-alias: {0,2}]   ;;  %s1795_s1 = inlined_call_operand.vmem [shape: bf16[2,128,128], index: 1, kind: input, shape index: {}]   ;;  %s1796_s2 = inlined_call_operand.vmem [shape: bf16[2,128,128], index: 2, kind: input, shape index: {}, may-alias: {0,2}]   ;;  %s1797_s3 = inlined_call_operand.vmem [shape: bf16[256,128], index: 3, kind: input, shape index: {}]   ;;  %s1798_s4 = inlined_call_operand.vmem [shape: f32[1,128], index: 4, kind: input, shape index: {}]   ;;  %s1799_s5 = inlined_call_operand.vmem [shape: f32[2,128,128], index: 5, kind: output, shape index: {}]  }
   0x1   :  { %s1636_s20 = smov 0  }
   0x2 LB: > { %s34_s21 = sadd.s32 1, %s1596_s19  ;;  %p1266_p0 = scmp.ge.s32.totalorder %s1600_s20, 1  ;;  %s1600_s20 = sphi %s1636_s20, %s15_s20   ;;  %s1596_s19 = sphi %s1634_s19, %s1801_s19   ;;  %s1592_s18 = sphi %s1632_s18, %s1800_s18  }
   0x3   : > { %p36_p1 = scmp.ge.s32.totalorder %s34_s21, 2  ;;  %p247_p2 = scmp.lt.s32.totalorder %s1600_s20, 3 }
   0x5   : > { %s1803_s21 = smov (%p36_p1, %s34_s21), 0  ;;  %p248_p3 = pnand %p1266_p0, %p247_p2 }
   0x6   : > { %p301_p4 = scmp.lt.s32.totalorder (!%p248_p3), %s1592_s18, 1  ;;  %v1554_v0 = vld [vmem:[%s1797_s3] sm:$0xff] (!%p248_p3)   ;;  %v1555_v1 = vld [vmem:[%s1797_s3 + $0x8] sm:$0xff] (!%p248_p3)   ;;  %v1556_v2 = vld [vmem:[%s1797_s3 + $0x10] sm:$0xff] (!%p248_p3)  }
   0x7   : > { %251 = sbr.rel (%p248_p3) target bundleno = 512 (0x200), region = 40  ;;  %1370 = vmatprep.subr.bf16.mxu0 (!%p248_p3), %v1554_v0  ;;  %v1557_v5 = vld [vmem:[%s1797_s3 + $0x18] sm:$0xff] (!%p248_p3)   ;;  %v1558_v7 = vld [vmem:[%s1797_s3 + $0x20] sm:$0xff] (!%p248_p3)   ;;  %v1559_v10 = vld [vmem:[%s1797_s3 + $0x28] sm:$0xff] (!%p248_p3)  }
   0x8   : > { %1371 = vmatpush3.bf16.msra.mxu0 (!%p248_p3), %v1554_v0  ;;  %v1560_v13 = vld [vmem:[%s1797_s3 + $0x30] sm:$0xff] (!%p248_p3)   ;;  %v1561_v14 = vld [vmem:[%s1797_s3 + $0x38] sm:$0xff] (!%p248_p3)   ;;  %v1564_v17 = vld [vmem:[%s1797_s3 + $0x40] sm:$0xff] (!%p248_p3)  }
   0x9   : > { %1372 = vmatprep.subr.bf16.mxu0 (!%p248_p3), %v1555_v1  ;;  %v1565_v21 = vld [vmem:[%s1797_s3 + $0x48] sm:$0xff] (!%p248_p3)   ;;  %v1568_v23 = vld [vmem:[%s1797_s3 + $0x50] sm:$0xff] (!%p248_p3)   ;;  %v1569_v27 = vld [vmem:[%s1797_s3 + $0x58] sm:$0xff] (!%p248_p3)  }
   0xa   : > { %v1572_v29 = vld [vmem:[%s1797_s3 + $0x60] sm:$0xff] (!%p248_p3)   ;;  %v1573_v33 = vld [vmem:[%s1797_s3 + $0x68] sm:$0xff] (!%p248_p3)   ;;  %v1576_v35 = vld [vmem:[%s1797_s3 + $0x70] sm:$0xff] (!%p248_p3)  }
   0xb   : > { %v1577_v39 = vld [vmem:[%s1797_s3 + $0x78] sm:$0xff] (!%p248_p3)  }
   0xc   : > { %1373 = vmatpush3.bf16.msra.mxu0 (!%p248_p3), %v1555_v1 }
   0xd   : > { %1374 = vmatprep.subr.bf16.mxu0 (!%p248_p3), %v1556_v2 }
   0xe   : > { %s1805_s18 = smov (!%p301_p4, %s1592_s18), 1 }
   0xf   : > { %s1659_s26 = sshll.u32 %s1805_s18, 6  ;;  %s1321_s24 = sshll.u32 %s1805_s18, 7 }
  0x10   : > { %s1668_s6 = scalar_lea.vmem %s1796_s2, %s1659_s26  ;;  %s1680_s11 = scalar_lea.vmem %s1795_s1, %s1659_s26  ;;  %1375 = vmatpush3.bf16.msra.mxu0 %v1556_v2 }
  0x11   : > { %v1538_v3 = vld [vmem:[%s1668_s6] sm:$0xff]   ;;  %v1539_v4 = vld [vmem:[%s1668_s6 + $0x8] sm:$0xff]   ;;  %v1540_v6 = vld [vmem:[%s1668_s6 + $0x10] sm:$0xff]   ;;  %1376 = vmatprep.subr.bf16.mxu0 %v1557_v5  ;;  %s1696_s22 = scalar_lea.vmem %s1794_s0, %s1659_s26  ;;  %s1762_s26 = scalar_lea.vmem %s1799_s5, %s1321_s24 }
  0x12   : > { %1402 = vmatprep.subr.bf16.mxu1 %v1538_v3  ;;  %v1541_v8 = vld [vmem:[%s1668_s6 + $0x18] sm:$0xff]   ;;  %v1546_v9 = vld [vmem:[%s1680_s11] sm:$0xff]   ;;  %v1543_v12 = vld [vmem:[%s1668_s6 + $0x28] sm:$0xff]  }
  0x13   : > { %1403 = vmatpush3.bf16.msra.mxu1 %v1538_v3  ;;  %1418 = vmatprep.mubr.bf16.mxu1 %v1546_v9  ;;  %v1542_v11 = vld [vmem:[%s1668_s6 + $0x20] sm:$0xff]   ;;  %v1544_v16 = vld [vmem:[%s1668_s6 + $0x30] sm:$0xff]   ;;  %v1545_v18 = vld [vmem:[%s1668_s6 + $0x38] sm:$0xff]  }
  0x14   : > { %1404 = vmatprep.subr.bf16.mxu1 %v1539_v4  ;;  %1377 = vmatpush3.bf16.msra.mxu0 %v1557_v5  ;;  %v1562_v15 = vld [vmem:[%s1696_s22] sm:$0xff]   ;;  %v1563_v19 = vld [vmem:[%s1696_s22 + $0x8] sm:$0xff]   ;;  %v1566_v20 = vld [vmem:[%s1696_s22 + $0x10] sm:$0xff]  }
  0x15   : > { %1378 = vmatprep.subr.bf16.mxu0 %v1558_v7  ;;  %1386 = vmatprep.mubr.bf16.mxu0 %v1562_v15  ;;  %v1547_v22 = vld [vmem:[%s1680_s11 + $0x8] sm:$0xff]   ;;  %v1548_v24 = vld [vmem:[%s1680_s11 + $0x10] sm:$0xff]   ;;  %v1567_v25 = vld [vmem:[%s1696_s22 + $0x18] sm:$0xff]  }
  0x16   : > { %v1570_v26 = vld [vmem:[%s1696_s22 + $0x20] sm:$0xff]   ;;  %v1549_v28 = vld [vmem:[%s1680_s11 + $0x18] sm:$0xff]   ;;  %v1571_v31 = vld [vmem:[%s1696_s22 + $0x28] sm:$0xff]  }
  0x17   : > { %1405 = vmatpush3.bf16.msra.mxu1 %v1539_v4  ;;  %v1550_v30 = vld [vmem:[%s1680_s11 + $0x20] sm:$0xff]   ;;  %v1574_v32 = vld [vmem:[%s1696_s22 + $0x30] sm:$0xff]   ;;  %v1551_v34 = vld [vmem:[%s1680_s11 + $0x28] sm:$0xff]  }
  0x18   : > { %1406 = vmatprep.subr.bf16.mxu1 %v1540_v6  ;;  %1379 = vmatpush3.bf16.msra.mxu0 %v1558_v7  ;;  %v1552_v36 = vld [vmem:[%s1680_s11 + $0x30] sm:$0xff]   ;;  %v1575_v37 = vld [vmem:[%s1696_s22 + $0x38] sm:$0xff]  }
  0x19   : > { %1380 = vmatprep.subr.bf16.mxu0 %v1559_v10  ;;  %v1553_v38 = vld [vmem:[%s1680_s11 + $0x38] sm:$0xff]  }
  0x1b   : > { %1407 = vmatpush3.bf16.msra.mxu1 %v1540_v6 }
  0x1c   : > { %1408 = vmatprep.subr.bf16.mxu1 %v1541_v8  ;;  %1381 = vmatpush3.bf16.msra.mxu0 %v1559_v10 }
  0x1d   : > { %1382 = vmatprep.subr.bf16.mxu0 %v1560_v13 }
  0x1f   : > { %1409 = vmatpush3.bf16.msra.mxu1 %v1541_v8  ;;  %v1275_v8 = vld [vmem:[%s1798_s4] ss:$0 sm:$0xff] }
  0x20   : > { %1410 = vmatprep.subr.bf16.mxu1 %v1542_v11  ;;  %1383 = vmatpush3.bf16.msra.mxu0 %v1560_v13 }
  0x21   : > { %1384 = vmatprep.subr.bf16.mxu0 %v1561_v14 }
  0x23   : > { %1411 = vmatpush3.bf16.msra.mxu1 %v1542_v11 }
  0x24   : > { %1412 = vmatprep.subr.bf16.mxu1 %v1543_v12  ;;  %1385 = vmatpush3.bf16.msra.mxu0 %v1561_v14 }
  0x25   : > { %1434 = vmatprep.subr.bf16.mxu0 %v1564_v17 }
  0x27   : > { %1413 = vmatpush3.bf16.msra.mxu1 %v1543_v12  ;;  %1387 = vmatmul.mubr.bf16.vlgmr.msra.gmra.mrb[0].mxu0 %v1563_v19 }
  0x28   : > { %1414 = vmatprep.subr.bf16.mxu1 %v1544_v16  ;;  %1435 = vmatpush3.bf16.msra.mxu0 %v1564_v17 }
  0x29   : > { %1390 = vmatprep.mubr.bf16.mxu0 %v1566_v20  ;;  %1436 = vmatprep.subr.bf16.mxu0 %v1565_v21 }
  0x2b   : > { %1415 = vmatpush3.bf16.msra.mxu1 %v1544_v16 }
  0x2c   : > { %1416 = vmatprep.subr.bf16.mxu1 %v1545_v18  ;;  %1437 = vmatpush3.bf16.msra.mxu0 %v1565_v21 }
  0x2d   : > { %1438 = vmatprep.subr.bf16.mxu0 %v1568_v23 }
  0x2f   : > { %1417 = vmatpush3.bf16.msra.mxu1 %v1545_v18  ;;  %1391 = vmatmul.mubr.bf16.gmra.mrb[4].mxu0 %v1567_v25 }
  0x30   : > { %1466 = vmatprep.subr.bf16.mxu1 %v1564_v17  ;;  %1439 = vmatpush3.bf16.msra.mxu0 %v1568_v23 }
  0x31   : > { %1394 = vmatprep.mubr.bf16.mxu0 %v1570_v26  ;;  %1440 = vmatprep.subr.bf16.mxu0 %v1569_v27 }
  0x32   : > { %1419 = vmatmul.mubr.bf16.vlgmr.msra.gmra.mrb[0].mxu1 %v1547_v22 }
  0x33   : > { %1422 = vmatprep.mubr.bf16.mxu1 %v1548_v24  ;;  %1474 = vmatpush3.bf16.msra.mxu1 %v1564_v17 }
  0x34   : > { %1467 = vmatprep.subr.bf16.mxu1 %v1565_v21  ;;  %1441 = vmatpush3.bf16.msra.mxu0 %v1569_v27 }
  0x35   : > { %1442 = vmatprep.subr.bf16.mxu0 %v1572_v29 }
  0x37   : > { %1475 = vmatpush3.bf16.msra.mxu1 %v1565_v21  ;;  %1395 = vmatmul.mubr.bf16.gmra.mrb[8].mxu0 %v1571_v31 }
  0x38   : > { %1468 = vmatprep.subr.bf16.mxu1 %v1568_v23  ;;  %1443 = vmatpush3.bf16.msra.mxu0 %v1572_v29 }
  0x39   : > { %1398 = vmatprep.mubr.bf16.mxu0 %v1574_v32  ;;  %1444 = vmatprep.subr.bf16.mxu0 %v1573_v33 }
  0x3a   : > { %1423 = vmatmul.mubr.bf16.gmra.mrb[4].mxu1 %v1549_v28 }
  0x3b   : > { %1426 = vmatprep.mubr.bf16.mxu1 %v1550_v30  ;;  %1476 = vmatpush3.bf16.msra.mxu1 %v1568_v23 }
  0x3c   : > { %1469 = vmatprep.subr.bf16.mxu1 %v1569_v27  ;;  %1445 = vmatpush3.bf16.msra.mxu0 %v1573_v33 }
  0x3d   : > { %1446 = vmatprep.subr.bf16.mxu0 %v1576_v35 }
  0x3f   : > { %1477 = vmatpush3.bf16.msra.mxu1 %v1569_v27  ;;  %1399 = vmatmul.mubr.bf16.gmra.mrb[12].mxu0 %v1575_v37 }
  0x40   : > { %1470 = vmatprep.subr.bf16.mxu1 %v1572_v29  ;;  %1447 = vmatpush3.bf16.msra.mxu0 %v1576_v35 }
  0x41   : > { %1448 = vmatprep.subr.bf16.mxu0 %v1577_v39 }
  0x42   : > { %1427 = vmatmul.mubr.bf16.gmra.mrb[8].mxu1 %v1551_v34 }
  0x43   : > { %1430 = vmatprep.mubr.bf16.mxu1 %v1552_v36  ;;  %1478 = vmatpush3.bf16.msra.mxu1 %v1572_v29 }
  0x44   : > { %1471 = vmatprep.subr.bf16.mxu1 %v1573_v33  ;;  %1449 = vmatpush3.bf16.msra.mxu0 %v1577_v39 }
  0x47   : > { %1479 = vmatpush3.bf16.msra.mxu1 %v1573_v33 }
  0x48   : > { %1472 = vmatprep.subr.bf16.mxu1 %v1576_v35 }
  0x4a   : > { %1431 = vmatmul.mubr.bf16.gmra.mrb[12].mxu1 %v1553_v38 }
  0x4b   : > { %1480 = vmatpush3.bf16.msra.mxu1 %v1576_v35 }
  0x4c   : > { %1473 = vmatprep.subr.bf16.mxu1 %v1577_v39 }
  0x4f   : > { %1481 = vmatpush3.bf16.msra.mxu1 %v1577_v39 }
 0x105   : > { %v1420_v40 = vpop.f32.mrb[0].mxu1 }
 0x106   : > { %v790_v41 = vpop.f32.mrb[1].mxu1 }
 0x107   : > { %v1421_v42 = vpop.f32.mrb[2].mxu1 }
 0x108   : > { %v921_v43 = vpack.c.bf16 %v1421_v42, %v1420_v40  ;;  %v793_v44 = vpop.f32.mrb[3].mxu1 }
 0x109   : > { %v920_v45 = vpack.c.bf16 %v793_v44, %v790_v41 }
 0x10a   : > { %v1396_v49 = vpop.f32.mrb[8].mxu0 }
 0x10b   : > { %1450 = vmatprep.mubr.bf16.mxu0 %v920_v45  ;;  %v560_v52 = vpop.f32.mrb[9].mxu0  ;;  %v569_v33 = vadd.f32 %v1396_v49, %v1275_v8 }
 0x10c   : > { %1451 = vmatmul.mubr.bf16.vlgmr.msra.gmra.mrb[0].mxu0 %v921_v43  ;;  %v1397_v54 = vpop.f32.mrb[10].mxu0  ;;  %v561_v34 = vadd.f32 %v1275_v8, %v560_v52 }
 0x10d   : > { %v1424_v46 = vpop.f32.mrb[4].mxu1  ;;  %v1745_v55 = vpop.f32.mrb[11].mxu0  ;;  %v572_v36 = vadd.f32 %v1397_v54, %v1275_v8 }
 0x10e   : > { %v806_v47 = vpop.f32.mrb[5].mxu1  ;;  %v564_v39 = vadd.f32 %v1275_v8, %v1745_v55 }
 0x10f   : > { %v1425_v48 = vpop.f32.mrb[6].mxu1 }
 0x110   : > { %v923_v50 = vpack.c.bf16 %v1425_v48, %v1424_v46  ;;  %v809_v51 = vpop.f32.mrb[7].mxu1 }
 0x111   : > { %v922_v53 = vpack.c.bf16 %v809_v51, %v806_v47 }
 0x112   : > { %v1747_v59 = vpop.f32.mrb[12].mxu0 }
 0x113   : > { %1454 = vmatprep.mubr.bf16.mxu0 %v922_v53  ;;  %v1749_v62 = vpop.f32.mrb[13].mxu0  ;;  %v585_v49 = vadd.f32 %v1747_v59, %v1275_v8 }
 0x114   : > { %1455 = vmatmul.mubr.bf16.gmra.mrb[4].mxu0 %v923_v50  ;;  %v1751_v0 = vpop.f32.mrb[14].mxu0  ;;  %v577_v50 = vadd.f32 %v1275_v8, %v1749_v62 }
 0x115   : > { %v1428_v56 = vpop.f32.mrb[8].mxu1  ;;  %v1753_v1 = vpop.f32.mrb[15].mxu0  ;;  %v588_v52 = vadd.f32 %v1751_v0, %v1275_v8 }
 0x116   : > { %v822_v57 = vpop.f32.mrb[9].mxu1  ;;  %v580_v55 = vadd.f32 %v1275_v8, %v1753_v1 }
 0x117   : > { %v1429_v58 = vpop.f32.mrb[10].mxu1 }
 0x118   : > { %v925_v60 = vpack.c.bf16 %v1429_v58, %v1428_v56  ;;  %v825_v61 = vpop.f32.mrb[11].mxu1 }
 0x119   : > { %v924_v63 = vpack.c.bf16 %v825_v61, %v822_v57 }
 0x11b   : > { %1458 = vmatprep.mubr.bf16.mxu1 %v924_v63 }
 0x11c   : > { %1459 = vmatmul.mubr.bf16.vlgmr.msra.gmra.mrb[16].mxu1 %v925_v60 }
 0x11d   : > { %v1432_v2 = vpop.f32.mrb[12].mxu1 }
 0x11e   : > { %v838_v3 = vpop.f32.mrb[13].mxu1 }
 0x11f   : > { %v1433_v4 = vpop.f32.mrb[14].mxu1 }
 0x120   : > { %v927_v5 = vpack.c.bf16 %v1433_v4, %v1432_v2  ;;  %v841_v6 = vpop.f32.mrb[15].mxu1 }
 0x121   : > { %v926_v7 = vpack.c.bf16 %v841_v6, %v838_v3 }
 0x123   : > { %1462 = vmatprep.mubr.bf16.mxu1 %v926_v7 }
 0x124   : > { %1463 = vmatmul.mubr.bf16.gmra.mrb[20].mxu1 %v927_v5 }
 0x1df   : > { %v1452_v9 = vpop.f32.mrb[0].mxu0 }
 0x1e0   : > { %v1482_v10 = vadd.f32 %v1452_v9, %v1275_v8  ;;  %v1026_v11 = vpop.f32.mrb[1].mxu0 }
 0x1e1   : > { %v1483_v12 = vadd.f32 %v1275_v8, %v1026_v11  ;;  %v1453_v13 = vpop.f32.mrb[2].mxu0 }
 0x1e2   : > { %v1107_v14 = vmax.f32 %v1482_v10, 0.0  ;;  %v1484_v15 = vadd.f32 %v1453_v13, %v1275_v8  ;;  %v1029_v16 = vpop.f32.mrb[3].mxu0 }
 0x1e3   : > { %v1105_v17 = vmax.f32 %v1483_v12, 0.0  ;;  %v1485_v18 = vadd.f32 %v1275_v8, %v1029_v16 }
 0x1e4   : > { %1123 = vst [vmem:[%s1762_s26 + $0x10] sm:$0xff] %v1107_v14  ;;  %v1108_v19 = vmax.f32 %v1484_v15, 0.0 }
 0x1e5   : > { %1121 = vst [vmem:[%s1762_s26] sm:$0xff] %v1105_v17  ;;  %v1106_v20 = vmax.f32 %v1485_v18, 0.0 }
 0x1e6   : > { %1124 = vst [vmem:[%s1762_s26 + $0x18] sm:$0xff] %v1108_v19 }
 0x1e7   : > { %1122 = vst [vmem:[%s1762_s26 + $0x8] sm:$0xff] %v1106_v20  ;;  %v1456_v21 = vpop.f32.mrb[4].mxu0 }
 0x1e8   : > { %v1486_v22 = vadd.f32 %v1456_v21, %v1275_v8  ;;  %v1042_v23 = vpop.f32.mrb[5].mxu0 }
 0x1e9   : > { %v1487_v24 = vadd.f32 %v1275_v8, %v1042_v23  ;;  %v1457_v25 = vpop.f32.mrb[6].mxu0 }
 0x1ea   : > { %v1111_v26 = vmax.f32 %v1486_v22, 0.0  ;;  %v1488_v27 = vadd.f32 %v1457_v25, %v1275_v8  ;;  %v1045_v28 = vpop.f32.mrb[7].mxu0 }
 0x1eb   : > { %v1109_v29 = vmax.f32 %v1487_v24, 0.0  ;;  %v1489_v30 = vadd.f32 %v1275_v8, %v1045_v28 }
 0x1ec   : > { %1127 = vst [vmem:[%s1762_s26 + $0x30] sm:$0xff] %v1111_v26  ;;  %v1112_v31 = vmax.f32 %v1488_v27, 0.0 }
 0x1ed   : > { %1125 = vst [vmem:[%s1762_s26 + $0x20] sm:$0xff] %v1109_v29  ;;  %v1110_v32 = vmax.f32 %v1489_v30, 0.0 }
 0x1ee   : > { %1128 = vst [vmem:[%s1762_s26 + $0x38] sm:$0xff] %v1112_v31 }
 0x1ef   : > { %1126 = vst [vmem:[%s1762_s26 + $0x28] sm:$0xff] %v1110_v32  ;;  %v1460_v35 = vpop.f32.mrb[16].mxu1 }
 0x1f0   : > { %v1099_v37 = vadd.f32 %v1460_v35, %v569_v33  ;;  %v1058_v38 = vpop.f32.mrb[17].mxu1 }
 0x1f1   : > { %v1097_v40 = vadd.f32 %v1058_v38, %v561_v34  ;;  %v1461_v41 = vpop.f32.mrb[18].mxu1 }
 0x1f2   : > { %v1115_v42 = vmax.f32 %v1099_v37, 0.0  ;;  %v1100_v43 = vadd.f32 %v1461_v41, %v572_v36  ;;  %v1061_v44 = vpop.f32.mrb[19].mxu1 }
 0x1f3   : > { %v1113_v45 = vmax.f32 %v1097_v40, 0.0  ;;  %v1098_v46 = vadd.f32 %v1061_v44, %v564_v39 }
 0x1f4   : > { %1131 = vst [vmem:[%s1762_s26 + $0x50] sm:$0xff] %v1115_v42  ;;  %v1116_v47 = vmax.f32 %v1100_v43, 0.0 }
 0x1f5   : > { %1129 = vst [vmem:[%s1762_s26 + $0x40] sm:$0xff] %v1113_v45  ;;  %v1114_v48 = vmax.f32 %v1098_v46, 0.0 }
 0x1f6   : > { %1132 = vst [vmem:[%s1762_s26 + $0x58] sm:$0xff] %v1116_v47 }
 0x1f7   : > { %1130 = vst [vmem:[%s1762_s26 + $0x48] sm:$0xff] %v1114_v48  ;;  %v1464_v51 = vpop.f32.mrb[20].mxu1 }
 0x1f8   : > { %v1103_v53 = vadd.f32 %v1464_v51, %v585_v49  ;;  %v1074_v54 = vpop.f32.mrb[21].mxu1 }
 0x1f9   : > { %v1101_v56 = vadd.f32 %v1074_v54, %v577_v50  ;;  %v1465_v57 = vpop.f32.mrb[22].mxu1 }
 0x1fa   : > { %v1119_v58 = vmax.f32 %v1103_v53, 0.0  ;;  %v1104_v60 = vadd.f32 %v1465_v57, %v588_v52  ;;  %v1077_v59 = vpop.f32.mrb[23].mxu1 }
 0x1fb   : > { %v1117_v61 = vmax.f32 %v1101_v56, 0.0  ;;  %v1102_v63 = vadd.f32 %v1077_v59, %v580_v55 }
 0x1fc   : > { %1135 = vst [vmem:[%s1762_s26 + $0x70] sm:$0xff] %v1119_v58  ;;  %v1120_v62 = vmax.f32 %v1104_v60, 0.0 }
 0x1fd   : > { %1133 = vst [vmem:[%s1762_s26 + $0x60] sm:$0xff] %v1117_v61  ;;  %v1118_v2 = vmax.f32 %v1102_v63, 0.0 }
 0x1fe   : > { %1136 = vst [vmem:[%s1762_s26 + $0x78] sm:$0xff] %v1120_v62 }
 0x1ff   : > { %1134 = vst [vmem:[%s1762_s26 + $0x68] sm:$0xff] %v1118_v2 }
 0x200 PF: > { %s15_s20 = sadd.s32 1, %s1600_s20   ;;  %s1800_s18 = smov %s1596_s19 }
 0x201   : > { %p12_p5 = scmp.ge.s32.totalorder %s15_s20, 4   ;;  %s1801_s19 = smov %s1803_s21 }
 0x203   :  { %14 = sbr.rel (!%p12_p5) target bundleno = 2 (0x2), region = 85 }

</bundles_post_ra>
